<compile_context>
chip_gen: v6e
topology: v6e:2x2x1
jax: 0.10.0
libtpu: 0.0.40
codegen_flags: <defaults>
</compile_context>

<pallas_src>
import functools
import math

import jax
import jax.numpy as jnp
from jax import lax
from jax.experimental import pallas as pl
from jax.experimental.pallas import tpu as pltpu


# --------------------------------------------------------------------------- kernel


def _attn_kernel(q_ref, k_ref, v_ref, out_ref, scores_ref=None, *,
                 scale, matmul_dtype, with_scores):
    # Refs (batch dim squeezed by BlockSpec):
    #   q_ref: (TQ, D), k_ref/v_ref: (S_k, D), out_ref: (TQ, D), scores_ref: (TQ, S_k)
    #
    # Fold 1/sqrt(d_k) into the small (TQ, D) q tile instead of the (TQ, S_k)
    # scores tile (S_k/D fewer multiplies).  Cast back to the matmul dtype so the
    # MXU stays on its fast (bf16) path when inputs are bf16.
    q = (q_ref[...].astype(jnp.float32) * scale).astype(matmul_dtype)
    k = k_ref[...].astype(matmul_dtype)
    v = v_ref[...].astype(matmul_dtype)

    # scores = (q * scale) @ k^T — contract over D directly (no explicit k.T copy).
    s = lax.dot_general(
        q, k,
        dimension_numbers=(((1,), (1,)), ((), ())),
        preferred_element_type=jnp.float32,
    )                                                     # (TQ, S_k) f32

    # Numerically stable softmax over keys (each tile holds the full key row).
    s = s - jnp.max(s, axis=-1, keepdims=True)
    p = jnp.exp(s)
    l = jnp.sum(p, axis=-1, keepdims=True)                # (TQ, 1)
    inv_l = pl.reciprocal(l, approx=True)                 # EUP slot (otherwise idle)
    inv_l = inv_l * (2.0 - l * inv_l)                     # one Newton step -> ~exact

    # outputs = softmax @ v.  The PV matmul consumes un-normalized p in the matmul
    # dtype (fast MXU path); only the small (TQ, D) result is rescaled afterwards.
    pv = lax.dot_general(
        p.astype(matmul_dtype), v,
        dimension_numbers=(((1,), (0,)), ((), ())),
        preferred_element_type=jnp.float32,
    )                                                     # (TQ, D) f32
    out_ref[...] = (pv * inv_l).astype(out_ref.dtype)

    if with_scores:
        scores_ref[...] = (p * inv_l).astype(scores_ref.dtype)


# ---------------------------------------------------------------- hardware queries


def _tpu_generation_info():
    """(vmem_capacity_bytes, mxu_m) for the local TPU, with safe fallbacks."""
    try:
        kind = jax.devices()[0].device_kind.lower()
    except Exception:  # pragma: no cover - defensive
        kind = ""

    # MXU M dimension: 256 on v6e/v7x, 128 on v5e and earlier.
    mxu_m = 128 if any(t in kind for t in ("v2", "v3", "v4", "v5")) else 256

    vmem_cap = None
    try:
        info = pltpu.get_tpu_info()
        for attr in ("vmem_capacity_bytes", "vmem_size_bytes", "vmem_bytes"):
            val = getattr(info, attr, None)
            if isinstance(val, int) and val > 0:
                vmem_cap = val
                break
    except Exception:  # pragma: no cover - defensive
        vmem_cap = None

    if vmem_cap is None or vmem_cap <= 0:
        # Conservative per-TensorCore guesses: v7x = 64 MiB, earlier gens = 128 MiB.
        vmem_cap = (64 << 20) if ("v7" in kind or "7x" in kind) else (128 << 20)
    return int(vmem_cap), int(mxu_m)


def _choose_tq(s_q, s_k, d, in_itemsize, out_itemsize, scores_itemsize,
               vmem_cap, mxu_m, with_scores):
    """Pick a query tile that feeds the MXU and fits the real VMEM budget."""
    headroom = 8 << 20
    usable = max(16 << 20, vmem_cap - headroom)

    # K + V are resident across q-tiles but still double-buffered by the default
    # pipeline (see TODO about pl.Buffered(1)).
    fixed = 2 * 2 * s_k * d * in_itemsize
    per_row = (2 * d * in_itemsize                 # q tile (double-buffered)
               + 2 * d * out_itemsize              # out tile (double-buffered)
               + 3 * s_k * 4)                      # in-kernel f32 temporaries (s, p, ...)
    if with_scores:
        per_row += 2 * s_k * scores_itemsize       # scores tile (double-buffered)

    tq_cap = max(8, (usable - fixed) // max(1, per_row))
    align = 16 if in_itemsize < 4 else 8

    tq = min(s_q, 1024, tq_cap)
    if tq >= s_q:
        return s_q
    if tq >= mxu_m:
        tq = (tq // mxu_m) * mxu_m                 # MXU-friendly M dimension
    else:
        tq = max(align, (tq // align) * align)

    # Prefer a tq that divides s_q (avoids an OOB-reading ragged last tile) as long
    # as it does not shrink the tile by more than ~2x.
    if s_q % tq != 0:
        cand = tq
        while cand >= max(align, tq // 2):
            if s_q % cand == 0:
                tq = cand
                break
            cand -= align
    return tq


# --------------------------------------------------------------------------- wrapper


def scaled_dot_attention(q, k, v, *, tq=None, scores_dtype=None,
                         matmul_dtype=None, return_scores=True):
    """q: (B, S_q, D), k/v: (B, S_k, D).

    Returns (outputs, scores) if return_scores else outputs, matching
    ScaledDotAttention.forward (scores == the SCORE_SAVER payload).
    """
    B, S_q, D = q.shape
    _, S_k, _ = k.shape
    scale = 1.0 / math.sqrt(D)

    in_dtype = jnp.dtype(q.dtype)
    scores_dtype = in_dtype if scores_dtype is None else jnp.dtype(scores_dtype)
    matmul_dtype = in_dtype if matmul_dtype is None else jnp.dtype(matmul_dtype)

    in_itemsize = in_dtype.itemsize
    scores_itemsize = scores_dtype.itemsize

    vmem_cap, mxu_m = _tpu_generation_info()

    if tq is None:
        tq = _choose_tq(S_q, S_k, D, in_itemsize, in_itemsize, scores_itemsize,
                        vmem_cap, mxu_m, return_scores)
    tq = int(min(tq, S_q))
    num_q_tiles = pl.cdiv(S_q, tq)

    kernel = functools.partial(_attn_kernel, scale=scale,
                               matmul_dtype=matmul_dtype,
                               with_scores=return_scores)

    # VMEM accounting: double-buffered blocks + in-kernel f32 temporaries.
    block_bytes = (
        2 * (tq * D * in_itemsize              # q tile
             + tq * D * in_itemsize)           # out tile
        + 2 * 2 * S_k * D * in_itemsize        # k + v (resident, double-buffered)
        + 3 * tq * S_k * 4                     # f32 temporaries (s, p, ...)
    )
    if return_scores:
        block_bytes += 2 * tq * S_k * scores_itemsize
    vmem_limit = max(32 << 20, block_bytes + (4 << 20))
    vmem_limit = int(min(vmem_limit, vmem_cap - (4 << 20)))   # never exceed physical VMEM

    scores_bytes = B * S_q * S_k * scores_itemsize if return_scores else 0
    cost = pl.CostEstimate(
        flops=4 * B * S_q * S_k * D,            # two matmuls
        transcendentals=B * S_q * S_k,          # exp
        bytes_accessed=((q.size + k.size + v.size + q.size) * in_itemsize
                        + scores_bytes),
    )

    out_spec_o = pl.BlockSpec((pl.Squeezed(), tq, D), lambda b, qi: (b, qi, 0))
    if return_scores:
        out_shape = (jax.ShapeDtypeStruct((B, S_q, D), q.dtype),
                     jax.ShapeDtypeStruct((B, S_q, S_k), scores_dtype))
        out_specs = [out_spec_o,
                     pl.BlockSpec((pl.Squeezed(), tq, S_k), lambda b, qi: (b, qi, 0))]
    else:
        out_shape = jax.ShapeDtypeStruct((B, S_q, D), q.dtype)
        out_specs = out_spec_o

    # With B > 1 keep the megacore split on batch boundaries so one batch's K/V is
    # never DMA'd into both TensorCores; with B == 1 parallelize the q-tile axis.
    dim_sem = ("parallel", "arbitrary") if B > 1 else ("parallel", "parallel")

    return pl.pallas_call(
        kernel,
        out_shape=out_shape,
        grid_spec=pltpu.PrefetchScalarGridSpec(
            num_scalar_prefetch=0,
            grid=(B, num_q_tiles),
            in_specs=[
                pl.BlockSpec((pl.Squeezed(), tq, D), lambda b, qi: (b, qi, 0)),
                # K/V block index constant across q-tiles -> stay resident, no re-DMA.
                pl.BlockSpec((pl.Squeezed(), S_k, D), lambda b, qi: (b, 0, 0)),
                pl.BlockSpec((pl.Squeezed(), S_k, D), lambda b, qi: (b, 0, 0)),
            ],
            out_specs=out_specs,
        ),
        compiler_params=pltpu.CompilerParams(
            dimension_semantics=dim_sem,
            vmem_limit_bytes=vmem_limit,
        ),
        cost_estimate=cost,
    )(q, k, v)


# ------------------------------------------------------------------------- reference


def _reference(q, k, v):
    d_k = q.shape[-1]
    s = jnp.einsum("bqd,bkd->bqk", q.astype(jnp.float32), k.astype(jnp.float32))
    s = s / jnp.sqrt(jnp.float32(d_k))
    p = jax.nn.softmax(s, axis=-1)
    return jnp.einsum("bqk,bkd->bqd", p, v.astype(jnp.float32)), p


if __name__ == "__main__":
    # --- Test 1: module-scale shapes (batch=2, seq=8, d_model=32), f32. ---
    kq, kk, kv = jax.random.split(jax.random.PRNGKey(0), 3)
    B, S, D = 2, 8, 32
    q = jax.random.normal(kq, (B, S, D), dtype=jnp.float32)
    k = jax.random.normal(kk, (B, S, D), dtype=jnp.float32)
    v = jax.random.normal(kv, (B, S, D), dtype=jnp.float32)

    outputs, scores = scaled_dot_attention(q, k, v)
    jax.block_until_ready((outputs, scores))
    ref_out, ref_scores = _reference(q, k, v)
    assert jnp.allclose(outputs, ref_out, atol=1e-4, rtol=1e-4)
    assert jnp.allclose(scores, ref_scores, atol=1e-4, rtol=1e-4)

    # --- Test 2: tiled q path (TQ < S_q, K/V resident across q-tiles), f32. ---
    kq2, kk2, kv2 = jax.random.split(jax.random.PRNGKey(1), 3)
    B2, SQ2, SK2, D2 = 2, 64, 128, 64
    q2 = jax.random.normal(kq2, (B2, SQ2, D2), dtype=jnp.float32)
    k2 = jax.random.normal(kk2, (B2, SK2, D2), dtype=jnp.float32)
    v2 = jax.random.normal(kv2, (B2, SK2, D2), dtype=jnp.float32)
    out2, sc2 = scaled_dot_attention(q2, k2, v2, tq=16)
    jax.block_until_ready((out2, sc2))
    ref_out2, ref_sc2 = _reference(q2, k2, v2)
    assert jnp.allclose(out2, ref_out2, atol=1e-4, rtol=1e-4)
    assert jnp.allclose(sc2, ref_sc2, atol=1e-4, rtol=1e-4)

    # --- Test 3: bf16 inputs -> bf16 scores (cheap writeback), auto TQ. ---
    q3 = q2.astype(jnp.bfloat16)
    k3 = k2.astype(jnp.bfloat16)
    v3 = v2.astype(jnp.bfloat16)
    out3, sc3 = scaled_dot_attention(q3, k3, v3)
    jax.block_until_ready((out3, sc3))
    ref_out3, ref_sc3 = _reference(q3, k3, v3)   # f32 math on bf16-quantized inputs
    assert jnp.allclose(out3.astype(jnp.float32), ref_out3, atol=3e-2, rtol=3e-2)
    assert jnp.allclose(sc3.astype(jnp.float32), ref_sc3, atol=3e-2, rtol=3e-2)

    # --- Test 4: scores output dropped (no SCORE_SAVER consumer). ---
    out4 = scaled_dot_attention(q2, k2, v2, return_scores=False)
    jax.block_until_ready(out4)
    assert jnp.allclose(out4, ref_out2, atol=1e-4, rtol=1e-4)

    # TODO(synk): the optional `mask` argument and the SCORE_SAVER.save side effect are
    # no-ops in the reference forward; scores are returned as an optional 2nd output.
    print("KERNEL_OK")
</pallas_src>

<mosaic_0001>
module attributes {stable_mosaic.version = 11 : i64} {
  func.func @_attn_kernel(%arg0: i32, %arg1: i32, %arg2: memref<1x8x32xf32, #tpu.memory_space<vmem>>, %arg3: memref<1x8x32xf32, #tpu.memory_space<vmem>>, %arg4: memref<1x8x32xf32, #tpu.memory_space<vmem>>, %arg5: memref<1x8x32xf32, #tpu.memory_space<vmem>>, %arg6: memref<1x8x8xf32, #tpu.memory_space<vmem>>) attributes {dimension_semantics = [#tpu.dimension_semantics<parallel>, #tpu.dimension_semantics<arbitrary>], iteration_bounds = array<i64: 2, 1>, scalar_prefetch = 0 : i64, scratch_operands = 0 : i64, tpu.core_type = #tpu.core_type<tc>, window_params = [{transform_indices = @transform_0, window_bounds = array<i64: 1, 8, 32>}, {transform_indices = @transform_1, window_bounds = array<i64: 1, 8, 32>}, {transform_indices = @transform_2, window_bounds = array<i64: 1, 8, 32>}, {transform_indices = @transform_3, window_bounds = array<i64: 1, 8, 32>}, {transform_indices = @transform_4, window_bounds = array<i64: 1, 8, 8>}]} {
    %c0 = arith.constant 0 : index
    %c0_0 = arith.constant 0 : index
    %c0_1 = arith.constant 0 : index
    %0 = vector.load %arg2[%c0, %c0_0, %c0_1] : memref<1x8x32xf32, #tpu.memory_space<vmem>>, vector<1x8x32xf32>
    %1 = vector.shape_cast %0 : vector<1x8x32xf32> to vector<8x32xf32>
    %cst = arith.constant 0.176776692 : f32
    %2 = vector.broadcast %cst : f32 to vector<8x32xf32>
    %3 = arith.mulf %1, %2 : vector<8x32xf32>
    %c0_2 = arith.constant 0 : index
    %c0_3 = arith.constant 0 : index
    %c0_4 = arith.constant 0 : index
    %4 = vector.load %arg3[%c0_2, %c0_3, %c0_4] : memref<1x8x32xf32, #tpu.memory_space<vmem>>, vector<1x8x32xf32>
    %5 = vector.shape_cast %4 : vector<1x8x32xf32> to vector<8x32xf32>
    %c0_5 = arith.constant 0 : index
    %c0_6 = arith.constant 0 : index
    %c0_7 = arith.constant 0 : index
    %6 = vector.load %arg4[%c0_5, %c0_6, %c0_7] : memref<1x8x32xf32, #tpu.memory_space<vmem>>, vector<1x8x32xf32>
    %7 = vector.shape_cast %6 : vector<1x8x32xf32> to vector<8x32xf32>
    %cst_8 = arith.constant dense<0.000000e+00> : vector<8x8xf32>
    %8 = tpu.matmul %3, %5, %cst_8 {dimension_numbers = #tpu.dot_dimension_numbers<[1], [1], [0], [0], [0, 0, 1, 0], [], []>} : vector<8x32xf32>, vector<8x32xf32>, vector<8x8xf32> -> vector<8x8xf32>
    %cst_9 = arith.constant dense<0xFF800000> : vector<8xf32>
    %9 = vector.multi_reduction <maximumf>, %8, %cst_9 [1] : vector<8x8xf32> to vector<8xf32>
    %10 = vector.shape_cast %9 : vector<8xf32> to vector<8x1xf32>
    %11 = vector.broadcast %10 : vector<8x1xf32> to vector<8x8xf32>
    %12 = arith.subf %8, %11 : vector<8x8xf32>
    %13 = math.exp %12 : vector<8x8xf32>
    %cst_10 = arith.constant dense<0.000000e+00> : vector<8xf32>
    %14 = vector.multi_reduction <add>, %13, %cst_10 [1] : vector<8x8xf32> to vector<8xf32>
    %15 = vector.shape_cast %14 : vector<8xf32> to vector<8x1xf32>
    %16 = tpu.reciprocal %15 {approx = true} : vector<8x1xf32> -> vector<8x1xf32>
    %17 = arith.mulf %15, %16 : vector<8x1xf32>
    %cst_11 = arith.constant 2.000000e+00 : f32
    %18 = vector.broadcast %cst_11 : f32 to vector<8x1xf32>
    %19 = arith.subf %18, %17 : vector<8x1xf32>
    %20 = arith.mulf %16, %19 : vector<8x1xf32>
    %cst_12 = arith.constant dense<0.000000e+00> : vector<8x32xf32>
    %21 = tpu.matmul %13, %7, %cst_12 {dimension_numbers = #tpu.dot_dimension_numbers<[1], [0], [0], [1], [0, 0, 1, 1], [], []>} : vector<8x8xf32>, vector<8x32xf32>, vector<8x32xf32> -> vector<8x32xf32>
    %22 = vector.broadcast %20 : vector<8x1xf32> to vector<8x32xf32>
    %23 = arith.mulf %21, %22 : vector<8x32xf32>
    %c0_13 = arith.constant 0 : index
    %c0_14 = arith.constant 0 : index
    %c0_15 = arith.constant 0 : index
    %24 = vector.load %arg5[%c0_13, %c0_14, %c0_15] : memref<1x8x32xf32, #tpu.memory_space<vmem>>, vector<1x8x32xf32>
    %25 = vector.shape_cast %24 : vector<1x8x32xf32> to vector<8x32xf32>
    %26 = vector.shape_cast %23 : vector<8x32xf32> to vector<1x8x32xf32>
    tpu.vector_store %arg5[%c0_13, %c0_14, %c0_15], %26 {strides = array<i32>} : memref<1x8x32xf32, #tpu.memory_space<vmem>>, vector<1x8x32xf32>,
    %27 = vector.broadcast %20 : vector<8x1xf32> to vector<8x8xf32>
    %28 = arith.mulf %13, %27 : vector<8x8xf32>
    %c0_16 = arith.constant 0 : index
    %c0_17 = arith.constant 0 : index
    %c0_18 = arith.constant 0 : index
    %29 = vector.load %arg6[%c0_16, %c0_17, %c0_18] : memref<1x8x8xf32, #tpu.memory_space<vmem>>, vector<1x8x8xf32>
    %30 = vector.shape_cast %29 : vector<1x8x8xf32> to vector<8x8xf32>
    %31 = vector.shape_cast %28 : vector<8x8xf32> to vector<1x8x8xf32>
    tpu.vector_store %arg6[%c0_16, %c0_17, %c0_18], %31 {strides = array<i32>} : memref<1x8x8xf32, #tpu.memory_space<vmem>>, vector<1x8x8xf32>,
    return
  }
  func.func @transform_0(%arg0: i32, %arg1: i32) -> (i32, i32, i32) {
    %c0_i32 = arith.constant 0 : i32
    %c0_i32_0 = arith.constant 0 : i32
    return %arg0, %arg1, %c0_i32 : i32, i32, i32
  }
  func.func @transform_1(%arg0: i32, %arg1: i32) -> (i32, i32, i32) {
    %c0_i32 = arith.constant 0 : i32
    %c0_i32_0 = arith.constant 0 : i32
    %c0_i32_1 = arith.constant 0 : i32
    return %arg0, %c0_i32, %c0_i32_0 : i32, i32, i32
  }
  func.func @transform_2(%arg0: i32, %arg1: i32) -> (i32, i32, i32) {
    %c0_i32 = arith.constant 0 : i32
    %c0_i32_0 = arith.constant 0 : i32
    %c0_i32_1 = arith.constant 0 : i32
    return %arg0, %c0_i32, %c0_i32_0 : i32, i32, i32
  }
  func.func @transform_3(%arg0: i32, %arg1: i32) -> (i32, i32, i32) {
    %c0_i32 = arith.constant 0 : i32
    %c0_i32_0 = arith.constant 0 : i32
    return %arg0, %arg1, %c0_i32 : i32, i32, i32
  }
  func.func @transform_4(%arg0: i32, %arg1: i32) -> (i32, i32, i32) {
    %c0_i32 = arith.constant 0 : i32
    %c0_i32_0 = arith.constant 0 : i32
    return %arg0, %arg1, %c0_i32 : i32, i32, i32
  }
}

</mosaic_0001>

<bundles_post_ra>
// kernel: tpu_custom_call.1
= control target key start
LH: loop header
LB: loop body
LE: loop exit
PB: predicated region body
PF: predicated region fallthrough
CT: control target
= control target key end

     0   :  { %s1262_s0 = inlined_call_operand.hbm [shape: f32[2,8,32], index: 0, kind: input, shape index: {}]   ;;  %s1263_s1 = inlined_call_operand.hbm [shape: f32[2,8,32], index: 1, kind: input, shape index: {}]   ;;  %s1264_s2 = inlined_call_operand.hbm [shape: f32[2,8,32], index: 2, kind: input, shape index: {}]   ;;  %s1265_s3 = inlined_call_operand.hbm [shape: f32[2,8,32], index: 3, kind: output, shape index: {0}]   ;;  %s1266_s4 = inlined_call_operand.hbm [shape: f32[2,8,8], index: 4, kind: output, shape index: {1}]  }
   0x1   :  { %1270 = sst [smem:[#allocation18_spill]] %s1263_s1 }
   0x2   :  { %10 = vsyncpa [#allocation3], 0 }
   0x3   :  { %12 = vsyncpa [#allocation3 + $0x1], 0 }
   0x4   :  { %13 = vsyncpa [#allocation6], 0 }
   0x5   :  { %15 = vsyncpa [#allocation6 + $0x1], 0 }
   0x6   :  { %16 = vsyncpa [#allocation4], 0 }
   0x7   :  { %18 = vsyncpa [#allocation4 + $0x1], 0 }
   0x8   :  { %19 = vsyncpa [#allocation10], 0 }
   0x9   :  { %21 = vsyncpa [#allocation10 + $0x1], 0  ;;  %s1030_s15 = smov 0   ;;  %s1032_s16 = smov 0  }
   0xa   :  { %s1034_s17 = smov 0   ;;  %s1036_s18 = smov 0  }
   0xb   :  { %s1038_s19 = smov 0   ;;  %s1040_s20 = smov 0  }
   0xc LB: > { %1271 = sst [smem:[#allocation15_spill]] %s992_s19  ;;  %s1061_s21 = sadd.s32 4294967295, %s996_s20   ;;  %s996_s20 = sphi %s1040_s20, %s27_s20   ;;  %s992_s19 = sphi %s1038_s19, %s1285_s19   ;;  %s988_s18 = sphi %s1036_s18, %s1284_s18   ;;  %s984_s17 = sphi %s1034_s17, %s1288_s17   ;;  %s980_s16 = sphi %s1032_s16, %s1287_s16   ;;  %s976_s15 = sphi %s1030_s15, %s1286_s15  }
   0xd   : > { %s677_s22 = sadd.s32 4294967294, %s996_s20   ;;  %s39_s23 = sadd.s32 1, %s992_s19 }
   0xe   : > { %s48_s24 = sadd.s32 1, %s984_s17  ;;  %p41_p0 = scmp.ge.s32.totalorder %s39_s23, 2 }
   0xf   : > { %p55_p1 = scmp.ne.s32.totalorder %s984_s17, %s980_s16  ;;  %p56_p2 = scmp.eq.s32.totalorder %s996_s20, 0 }
  0x10   : > { %p61_p3 = scmp.ne.s32.totalorder %s980_s16, %s976_s15  ;;  %s1290_s23 = smov (%p41_p0, %s39_s23), 0 }
  0x11   : > { %1272 = sst [smem:[#allocation16_spill]] %s1290_s23  ;;  %p1073_p4 = por %p56_p2, %p55_p1 }
  0x12   : > { %p62_p5 = scmp.eq.s32.totalorder %s1061_s21, 0  ;;  %s43_s26 = ssub.s32 %s992_s19, %s1290_s23 }
  0x13   : > { %p139_p6 = scmp.eq.s32.totalorder %s1061_s21, 1  ;;  %p46_p7 = scmp.eq.s32.totalorder %s43_s26, 0 }
  0x14   : > { %p1081_p8 = por %p62_p5, %p61_p3  ;;  %p145_p10 = scmp.eq.s32.totalorder %s677_s22, 1 }
  0x15   : > { %p1085_p9 = por %p139_p6, %p55_p1  ;;  %p742_p13 = scmp.lt.s32.totalorder %s996_s20, 2 }
  0x16   : > { %s1090_s29 = scalar_select %p46_p7, %s984_s17, %s48_s24  }
  0x17   : > { %p1092_p11 = por %p145_p10, %p61_p3  ;;  %s1267_s5 = sand.u32 1, %s984_s17  }
  0x18   : > { %1276 = sst [smem:[#allocation17_spill]] %s1090_s29  ;;  %s1101_s6 = sshll.u32 %s1267_s5, 3 }
  0x19   : > { %s1104_s7 = sshll.u32 %s992_s19, 7  ;;  %p1108_p0 = pnand %p742_p13, %p1073_p4 }
  0x1a   : > { %s212_s9 = sand.u32 1, %s996_s20   ;;  %s1279_s1 = sld [smem:[#allocation18_spill]] }
  0x1b   : > { %s216_s13 = scalar_lea.vmem [#allocation5], %s1101_s6  ;;  %p686_p1 = scmp.ge.s32.totalorder %s996_s20, 1 }
  0x1c   : > { %s223_s14 = sshll.u32 %s216_s13, 4  ;;  %p246_p2 = scmp.lt.s32.totalorder %s996_s20, 3  ;;  %s224_s14 = int_to_ptr.vmem [resolvable:$true] %s223_s14 }
  0x1d   : > { %s1120_s22 = scalar_lea.sflag [#allocation6], %s212_s9  ;;  %p800_p3 = pneg %p1108_p0 }
  0x1e   : > { %s811_s24 = scalar_lea.vmem %s224_s14, 128  ;;  %s998_s25 = smov [#allocation5]  }
  0x1f   : > { %p812_p4 = scmp.ne.s32.totalorder %s224_s14, %s811_s24  ;;  %s816_s26 = sshll.u32 %s998_s25, 4  ;;  %s817_s26 = int_to_ptr.vmem [resolvable:$false] %s816_s26 }
  0x20   : > { %s221_s12 = scalar_lea.hbm %s1279_s1, %s1104_s7  ;;  %s818_s10 = scalar_lea.vmem %s817_s26, 256 }
  0x21   : > { %p814_p5 = pnand %p812_p4, %p800_p3  ;;  %p819_p7 = scmp.lt.s32.totalorder %s224_s14, %s817_s26 }
  0x22   : > { %p820_p10 = scmp.lt.s32.totalorder %s818_s10, %s811_s24 }
  0x23   : > { %p815_p6 = pneg %p814_p5 }
  0x24   : > { %p821_p13 = por %p820_p10, %p819_p7 }
  0x26   : > { %p822_p12 = pnand %p821_p13, %p815_p6 }
  0x28   : > { %825 = shalt.err (!%p822_p12)
}
  0x29   : > { %731 = dma.hbm_to_vmem [thread:$0]  (!%p1108_p0), %s221_s12, 128, %s224_s14, %s1120_s22  }
  0x2a   : > { %p1134_p4 = pnand %p686_p1, %p246_p2  ;;  %s203_s24 = scalar_lea.hbm %s1262_s0, %s1104_s7 }
  0x2b   : > { %s197_s25 = scalar_lea.vmem [#allocation2], %s1101_s6  ;;  %s239_s1 = scalar_lea.hbm %s1264_s2, %s1104_s7 }
  0x2c   : > { %s205_s26 = sshll.u32 %s197_s25, 4  ;;  %s1281_s23 = sand.u32 1, %s984_s17   ;;  %s206_s26 = int_to_ptr.vmem [resolvable:$true] %s205_s26 }
  0x2d   : > { %s194_s19 = scalar_lea.sflag [#allocation3], %s1281_s23  ;;  %s839_s12 = scalar_lea.vmem %s206_s26, 128 }
  0x2e   : > { %p840_p12 = scmp.ne.s32.totalorder %s206_s26, %s839_s12  ;;  %s999_s14 = smov [#allocation2]  }
  0x2f   : > { %s844_s29 = sshll.u32 %s999_s14, 4  ;;  %s845_s29 = int_to_ptr.vmem [resolvable:$false] %s844_s29 }
  0x30   : > { %p842_p1 = pnand %p840_p12, %p800_p3  ;;  %s846_s11 = scalar_lea.vmem %s845_s29, 256 }
  0x31   : > { %p847_p5 = scmp.lt.s32.totalorder %s206_s26, %s845_s29  ;;  %p848_p6 = scmp.lt.s32.totalorder %s846_s11, %s839_s12 }
  0x32   : > { %p843_p2 = pneg %p842_p1 }
  0x33   : > { %p849_p7 = por %p848_p6, %p847_p5 }
  0x35   : > { %p850_p10 = pnand %p849_p7, %p843_p2 }
  0x37   : > { %853 = shalt.err (!%p850_p10)
}
  0x38   : > { %728 = dma.hbm_to_vmem [thread:$0]  (!%p1108_p0), %s203_s24, 128, %s206_s26, %s194_s19  }
  0x39   : > { %s234_s23 = scalar_lea.vmem [#allocation7], %s1101_s6  ;;  %s1000_s25 = smov [#allocation7]  }
  0x3a   : > { %s241_s5 = sshll.u32 %s234_s23, 4  ;;  %s872_s29 = sshll.u32 %s1000_s25, 4  ;;  %s242_s5 = int_to_ptr.vmem [resolvable:$true] %s241_s5  ;;  %s873_s29 = int_to_ptr.vmem [resolvable:$false] %s872_s29 }
  0x3b   : > { %s867_s13 = scalar_lea.vmem %s242_s5, 128  ;;  %s874_s10 = scalar_lea.vmem %s873_s29, 256 }
  0x3c   : > { %p868_p13 = scmp.ne.s32.totalorder %s242_s5, %s867_s13  ;;  %p875_p2 = scmp.lt.s32.totalorder %s242_s5, %s873_s29 }
  0x3d   : > { %p876_p5 = scmp.lt.s32.totalorder %s874_s10, %s867_s13 }
  0x3e   : > { %p870_p12 = pnand %p868_p13, %p800_p3 }
  0x3f   : > { %p877_p6 = por %p876_p5, %p875_p2 }
  0x40   : > { %p871_p1 = pneg %p870_p12 }
  0x42   : > { %p878_p7 = pnand %p877_p6, %p871_p1 }
  0x44   : > { %881 = shalt.err (!%p878_p7)
}
  0x45   : > { %734 = dma.hbm_to_vmem [thread:$0]  (!%p1108_p0), %s239_s1, 128, %s242_s5, %s1120_s22  }
  0x46   : > { %250 = sbr.rel (%p1134_p4) target bundleno = 643 (0x283), region = 32  ;;  %s1169_s24 = sand.u32 (!%p1134_p4), 1, %s980_s16  }
  0x47   : > { %s1172_s26 = sshll.u32 (!%p1134_p4), %s1169_s24, 3  ;;  %s253_s8 = scalar_lea.sflag (!%p1134_p4), [#allocation3], %s1169_s24 }
  0x48   : > { %s256_s12 = scalar_lea.vmem (!%p1134_p4), [#allocation2], %s1172_s26 }
  0x4b   : > { %959 = dma.done.wait (%p1081_p8), %s253_s8, 128  }
  0x4c   : > { %961 = vsyncadd (%p1081_p8), %s253_s8, 4294967168  ;;  %s261_s1 = sand.u32 1, %s1061_s21   ;;  %s265_s22 = scalar_lea.vmem [#allocation5], %s1172_s26 }
  0x4d   : > { %s262_s7 = scalar_lea.sflag [#allocation6], %s261_s1 }
  0x4e   : > { %963 = dma.done.wait (%p1081_p8), %s262_s7, 256  }
  0x4f   : > { %965 = vsyncadd (%p1081_p8), %s262_s7, 4294967040  ;;  %v1001_v0 = vmov 0.0   ;;  %vm1002_vm0 = vmmov 0   ;;  %vm318_vm1 = vcmask 261120   ;;  %v316_v1 = vld [vmem:[%s265_s22] sm:$0xff]  ;;  %v314_v2 = vld [vmem:[%s256_s12] sm:$0xff] }
  0x50   : > { %705 = vmatprep.subr.mxu0 %v1001_v0  ;;  %707 = vmatprep.mubr.msk.f32.mxu0 %vm1002_vm0, %v1001_v0  ;;  %v315_v3 = vmul.f32 0.17677669, %v314_v2  ;;  %vm395_vm2 = vcmask 64512   ;;  %s274_s21 = scalar_lea.vmem [#allocation7], %s1172_s26  ;;  %s697_s27 = sshll.u32 %s988_s18, 7 }
  0x51   : > { %710 = vmatprep.subr.mxu1 %v1001_v0  ;;  %712 = vmatprep.mubr.msk.f32.mxu1 %vm1002_vm0, %v1001_v0  ;;  %v317_v7 = vld [vmem:[%s274_s21] sm:$0xff]  ;;  %s313_s9 = scalar_lea.vmem [#allocation9], %s1172_s26  ;;  %s518_s5 = scalar_lea.hbm %s1266_s4, %s697_s27 }
  0x52   : > { %706 = vmatpush3.xpose.msk.msra.mxu0 %vm318_vm1, %v316_v1  ;;  %711 = vmatpush3.msra.mxu1 %v317_v7  ;;  %s520_s14 = sshll.u32 %s313_s9, 4  ;;  %s492_s13 = scalar_lea.sflag [#allocation10], %s1169_s24  ;;  %s521_s14 = int_to_ptr.vmem [resolvable:$true] %s520_s14 }
  0x53   : > { %s882_s25 = scalar_lea.vmem %s521_s14, 128  ;;  %s1003_s29 = smov [#allocation9]  }
  0x54   : > { %p883_p8 = scmp.ne.s32.totalorder %s521_s14, %s882_s25  ;;  %s886_s10 = sshll.u32 %s1003_s29, 4  ;;  %s887_s10 = int_to_ptr.vmem [resolvable:$false] %s886_s10 }
  0x55   : > { %708 = vmatmul.mubr.msk.f32.vlgmr.msra.gmra.mxu0 %vm318_vm1, %v315_v3  ;;  %s888_s19 = scalar_lea.vmem %s887_s10, 256  ;;  %p889_p4 = scmp.lt.s32.totalorder %s521_s14, %s887_s10 }
  0x56   : > { %p884_p0 = pnand %p883_p8, %p1085_p9  ;;  %p890_p10 = scmp.lt.s32.totalorder %s888_s19, %s882_s25 }
  0x58   : > { %p885_p3 = pneg %p884_p0  ;;  %p891_p13 = por %p890_p10, %p889_p4 }
  0x5a   : > { %p892_p12 = pnand %p891_p13, %p885_p3 }
 0x115   : > { %v391_v4 = vpop.f32.mrf.mxu0 }
 0x116   : > { %v396_v5 = vsel %vm395_vm2, %v391_v4, -inf }
 0x117   : > { %397 = vmax.xlane.f32.xlu0 %v396_v5  ;;  %v709_v6 = vpop.f32.mrf.mxu0 }
 0x1a0   : > { %v398_v8 = vpop.xlane.xlu0 %397 }
 0x1a1   : > { %v399_v9 = vsub.f32 %v391_v4, %v398_v8 }
 0x1a3   : > { %v400_v10 = vmul.f32 1.442695, %v399_v9 }
 0x1a5   : > { %794 = vpow2.f32 %v400_v10 }
 0x1b2   : > { %v795_v11 = vpop.eup %794 }
 0x1b3   : > { %713 = vmatmul.mubr.msk.f32.vlgmr.msra.gmra.mxu1 %vm395_vm2, %v795_v11  ;;  %v402_v12 = vsel %vm395_vm2, %v795_v11, 0.0 }
 0x1b4   : > { %403 = vadd.xlane.f32.xlu0 %v402_v12 }
 0x23d   : > { %v404_v13 = vpop.xlane.xlu0 %403 }
 0x23e   : > { %796 = vrcp.f32 %v404_v13 }
 0x24b   : > { %v797_v14 = vpop.eup %796 }
 0x24c   : > { %v406_v15 = vmul.f32 %v797_v14, %v404_v13 }
 0x24e   : > { %v407_v16 = vsub.f32 2.0, %v406_v15 }
 0x250   : > { %v408_v17 = vmul.f32 %v797_v14, %v407_v16 }
 0x252   : > { %v484_v18 = vmul.f32 %v795_v11, %v408_v17 }
 0x254   : > { %485 = vst.msk [vmem:[%s313_s9] sm:$0xff] %vm395_vm2, %v484_v18 }
 0x255   : > { %895 = shalt.err (!%p892_p12)
}
 0x256   : > { %s896_s6 = scalar_lea.hbm %s518_s5, 128  ;;  %s900_s1 = scalar_lea.hbm %s1266_s4, 256 }
 0x257   : > { %p897_p1 = scmp.ne.s32.totalorder %s518_s5, %s896_s6  ;;  %p901_p6 = scmp.lt.s32.totalorder %s518_s5, %s1266_s4 }
 0x258   : > { %p902_p7 = scmp.lt.s32.totalorder %s900_s1, %s896_s6 }
 0x259   : > { %p898_p2 = pnand %p897_p1, %p1085_p9 }
 0x25a   : > { %p903_p8 = por %p902_p7, %p901_p6 }
 0x25b   : > { %p899_p5 = pneg %p898_p2 }
 0x25d   : > { %p904_p0 = pnand %p903_p8, %p899_p5 }
 0x25f   : > { %907 = shalt.err (!%p904_p0)
}
 0x260   : > { %722 = dma.vmem_to_hbm [thread:$0]  (%p1085_p9), %s521_s14, 128, %s518_s5, %s492_s13  }
 0x261   : > { %s306_s21 = scalar_lea.vmem [#allocation8], %s1172_s26  ;;  %s1219_s25 = scalar_lea.hbm %s1265_s3, %s697_s27 }
 0x262   : > { %s506_s9 = sshll.u32 %s306_s21, 4  ;;  %s487_s29 = scalar_lea.sflag [#allocation4], %s1169_s24  ;;  %s507_s9 = int_to_ptr.vmem [resolvable:$true] %s506_s9 }
 0x263   : > { %s908_s10 = scalar_lea.vmem %s507_s9, 128  ;;  %s1004_s26 = smov [#allocation8]  }
 0x264   : > { %p909_p3 = scmp.ne.s32.totalorder %s507_s9, %s908_s10  ;;  %s912_s14 = sshll.u32 %s1004_s26, 4  ;;  %s913_s14 = int_to_ptr.vmem [resolvable:$false] %s912_s14 }
 0x265   : > { %s914_s5 = scalar_lea.vmem %s913_s14, 256  ;;  %p915_p13 = scmp.lt.s32.totalorder %s507_s9, %s913_s14 }
 0x266   : > { %p910_p4 = pnand %p909_p3, %p1085_p9  ;;  %p916_p12 = scmp.lt.s32.totalorder %s914_s5, %s908_s10 }
 0x268   : > { %p911_p10 = pneg %p910_p4  ;;  %p917_p1 = por %p916_p12, %p915_p13 }
 0x26a   : > { %p918_p2 = pnand %p917_p1, %p911_p10 }
 0x273   : > { %v478_v19 = vpop.f32.mrf.mxu1 }
 0x274   : > { %v482_v20 = vmul.f32 %v478_v19, %v408_v17 }
 0x275   : > { %v714_v21 = vpop.f32.mrf.mxu1 }
 0x276   : > { %483 = vst.msk [vmem:[%s306_s21] sm:$0xff] %vm318_vm1, %v482_v20 }
 0x277   : > { %921 = shalt.err (!%p918_p2)
}
 0x278   : > { %s922_s18 = scalar_lea.hbm %s1219_s25, 128  ;;  %s926_s13 = scalar_lea.hbm %s1265_s3, 256 }
 0x279   : > { %p923_p5 = scmp.ne.s32.totalorder %s1219_s25, %s922_s18  ;;  %p927_p8 = scmp.lt.s32.totalorder %s1219_s25, %s1265_s3 }
 0x27a   : > { %p928_p0 = scmp.lt.s32.totalorder %s926_s13, %s922_s18 }
 0x27b   : > { %p924_p6 = pnand %p923_p5, %p1085_p9 }
 0x27c   : > { %p929_p3 = por %p928_p0, %p927_p8 }
 0x27d   : > { %p925_p7 = pneg %p924_p6 }
 0x27f   : > { %p930_p4 = pnand %p929_p3, %p925_p7 }
 0x281   : > { %933 = shalt.err (!%p930_p4)
}
 0x282   : > { %721 = dma.vmem_to_hbm [thread:$0]  (%p1085_p9), %s507_s9, 128, %s1219_s25, %s487_s29  }
 0x283 PF: > { %s532_s8 = sand.u32 1, %s976_s15   ;;  %p1282_p10 = scmp.ge.s32.totalorder %s996_s20, 2 }
 0x284   : > { %s533_s12 = scalar_lea.sflag [#allocation4], %s532_s8 }
 0x285   : > { %p736_p13 = pnand %p1282_p10, %p1092_p11 }
 0x287   : > { %p737_p12 = pneg %p736_p13 }
 0x289   : > { %967 = dma.done.wait (%p737_p12), %s533_s12, 128  }
 0x28a   : > { %969 = vsyncadd (%p737_p12), %s533_s12, 4294967168  ;;  %s542_s1 = scalar_lea.sflag [#allocation10], %s532_s8 }
 0x28b   : > { %971 = dma.done.wait (%p737_p12), %s542_s1, 128  }
 0x28c   : > { %973 = vsyncadd (%p737_p12), %s542_s1, 4294967168  ;;  %s27_s20 = sadd.s32 1, %s996_s20   ;;  %s1283_s28 = sld [smem:[#allocation17_spill]] }
 0x28d   : > { %p24_p1 = scmp.ge.s32.totalorder %s27_s20, 4   ;;  %s1284_s18 = sld [smem:[#allocation15_spill]] }
 0x28e   : > { %s1285_s19 = sld [smem:[#allocation16_spill]]  ;;  %s1286_s15 = smov %s980_s16 }
 0x28f   : > { %s1287_s16 = smov %s984_s17  ;;  %26 = sbr.rel (!%p24_p1) target bundleno = 12 (0xc), region = 118 }
 0x292   : > { %s1288_s17 = smov %s1283_s28 }
 0x294   :  { %547 = vsyncpa [#allocation3], 1 }
 0x295   :  { %549 = vsyncpa [#allocation3 + $0x1], 1 }
 0x296   :  { %550 = vsyncpa [#allocation6], 1 }
 0x297   :  { %552 = vsyncpa [#allocation6 + $0x1], 1 }
 0x298   :  { %553 = vsyncpa [#allocation4], 1 }
 0x299   :  { %555 = vsyncpa [#allocation4 + $0x1], 1 }
 0x29a   :  { %556 = vsyncpa [#allocation10], 1 }
 0x29b   :  { %558 = vsyncpa [#allocation10 + $0x1], 1 }

</bundles_post_ra>
